<compile_context>
chip_gen: v6e
topology: v6e:2x2x1
jax: 0.10.0
libtpu: 0.0.40
codegen_flags: <defaults>
</compile_context>

<pallas_src>
import jax
import jax.numpy as jnp
from jax.experimental import pallas as pl
from jax.experimental.pallas import tpu as pltpu


# ---------------------------------------------------------------------------
# Kernel: broadcast add of a (1, col_tile) PE slab onto a (rows, col_tile) tile
# ---------------------------------------------------------------------------
def _pe_add_kernel(x_ref, pe_ref, o_ref):
    o_ref[...] = x_ref[...] + pe_ref[...]


# ---------------------------------------------------------------------------
# Host-side helpers
# ---------------------------------------------------------------------------
_SUBLANE_FOR_ITEMSIZE = {4: 8, 2: 16, 1: 32}   # dtype-packed sublane multiple


def _pe_row(D):
    """(D,) positional-encoding row, identical to the PyTorch module."""
    if D % 2 != 0:
        # The reference module would also fail (shape mismatch on pe[:, 1::2]).
        raise ValueError(f"embedding_dim must be even, got {D}")
    exp = jnp.arange(0, D, 2, dtype=jnp.float32) / jnp.float32(D)
    denom = jnp.power(jnp.float32(10000.0), exp)           # (D//2,)
    pe = jnp.zeros((D,), dtype=jnp.float32)
    pe = pe.at[0::2].set(jnp.sin(denom))
    pe = pe.at[1::2].set(jnp.cos(denom))
    return pe


def _vmem_capacity_bytes():
    """Physical per-core VMEM; conservative (v7x) fallback if unavailable."""
    try:
        return int(pltpu.get_tpu_info().vmem_capacity_bytes)
    except Exception:
        return 64 << 20


# ---------------------------------------------------------------------------
# Wrapper
# ---------------------------------------------------------------------------
def positional_encoding_add(x, *, max_tile_bytes=None, donate_x=False,
                            force_pallas=False, min_pallas_bytes=1 << 20):
    """x: (B, S, D) -> x + pe (same shape), matching _PositionalEncoding.forward."""
    B, S, D = x.shape
    itemsize = jnp.dtype(x.dtype).itemsize
    pe_row = _pe_row(D).astype(x.dtype)                     # (D,)

    total_bytes = B * S * D * itemsize
    if not force_pallas and total_bytes < min_pallas_bytes:
        # Tiny tensors: custom-call launch + per-grid-step overhead dominates;
        # XLA's fused broadcast add wins outright.
        return x + pe_row[None, None, :]

    # --- choose a lane-dense 2-D flattening (last dim multiple of 128) -------
    if D % 128 == 0:
        nrows, ncols = B * S, D
        pe_flat = pe_row.reshape(1, D)
    elif (S * D) % 128 == 0:
        nrows, ncols = B, S * D
        pe_flat = jnp.broadcast_to(pe_row, (S, D)).reshape(1, S * D)
    else:
        if not force_pallas:
            # No 128-aligned flattening: masked partial stores would dominate.
            return x + pe_row[None, None, :]
        nrows, ncols = B, S * D
        pe_flat = jnp.broadcast_to(pe_row, (S, D)).reshape(1, S * D)
    x2d = x.reshape(nrows, ncols)

    # --- per-generation VMEM budget ------------------------------------------
    vmem = _vmem_capacity_bytes()
    sublane = _SUBLANE_FOR_ITEMSIZE.get(itemsize, 8)
    if max_tile_bytes is None:
        # (x block + out block) x 2 double buffers ~= 4 x block bytes resident.
        # 6 MiB on 128 MiB chips (v5e/v6e), 4 MiB on v7x's 64 MiB.
        max_tile_bytes = min(6 << 20, vmem // 16)
    # Floor so that one sublane-group of 128 lanes always fits.
    max_tile_bytes = max(max_tile_bytes, 128 * sublane * itemsize)
    max_block_elems = max(1, max_tile_bytes // itemsize)

    # --- column (lane) tiling: multiples of 128 -------------------------------
    lane_aligned = (ncols % 128 == 0)
    if (not lane_aligned) or (ncols * sublane * itemsize <= max_tile_bytes):
        col_tile = ncols                      # full width fits (or forced path)
    else:
        col_tile = max(128, ((max_block_elems // sublane) // 128) * 128)
        col_tile = min(col_tile, ncols)

    # --- row (sublane) tiling: dtype-packed multiple, budget-clamped ----------
    rows_per_tile = max(1, max_block_elems // col_tile)
    if rows_per_tile < nrows:
        # Block sublane dim must be a multiple of 8 (use the packed multiple);
        # in the column-tiled branch col_tile already guarantees this fits the
        # byte budget, so the bump never blows it up.
        rows_per_tile = max(sublane, (rows_per_tile // sublane) * sublane)
    rows_per_tile = min(rows_per_tile, nrows)

    grid = (pl.cdiv(nrows, rows_per_tile), pl.cdiv(ncols, col_tile))

    # --- scoped-VMEM limit: above actual need, below physical -----------------
    block_bytes = rows_per_tile * col_tile * itemsize
    pe_bytes = col_tile * itemsize
    resident = 2 * (2 * block_bytes + pe_bytes)        # 2-deep buffers, + slack
    vmem_limit = int(min(vmem * 3 // 4, max(32 << 20, 2 * resident)))

    out2d = pl.pallas_call(
        _pe_add_kernel,
        out_shape=jax.ShapeDtypeStruct((nrows, ncols), x.dtype),
        grid=grid,
        in_specs=[
            pl.BlockSpec((rows_per_tile, col_tile), lambda i, j: (i, j)),
            pl.BlockSpec((1, col_tile), lambda i, j: (0, j)),  # same PE rows
        ],
        out_specs=pl.BlockSpec((rows_per_tile, col_tile), lambda i, j: (i, j)),
        compiler_params=pltpu.CompilerParams(
            dimension_semantics=("parallel", "parallel"),
            vmem_limit_bytes=vmem_limit,
        ),
        input_output_aliases=({0: 0} if donate_x else {}),
    )(x2d, pe_flat)
    return out2d.reshape(B, S, D)


# ---------------------------------------------------------------------------
# Pure-JAX reference mirroring the PyTorch forward exactly
# ---------------------------------------------------------------------------
def _reference(x):
    B, S, D = x.shape
    pe = _pe_row(D)                               # every position identical
    return x + pe[None, None, :].astype(x.dtype)


if __name__ == "__main__":
    B, S, D = 2, 8, 32   # batch, num_samples (seq), embedding_dim
    key = jax.random.PRNGKey(0)
    x = jax.random.normal(key, (B, S, D), dtype=jnp.float32)

    ref = jax.block_until_ready(_reference(x))

    # 1) Force the Pallas path at the small shape (single (2, 256) block).
    out = jax.block_until_ready(positional_encoding_add(x, force_pallas=True))
    assert out.shape == (B, S, D)
    assert jnp.allclose(out, ref, atol=1e-5, rtol=1e-5)

    # 2) Default path (small-tensor XLA short-circuit) must agree too.
    out_default = jax.block_until_ready(positional_encoding_add(x))
    assert jnp.allclose(out_default, ref, atol=1e-5, rtol=1e-5)

    # 3) Exercise the 2-D (rows x 128-lane columns) tiling: tiny budget forces
    #    (8, 128) blocks on a (16, 256) slab -> grid (2, 2).
    x2 = jax.random.normal(jax.random.PRNGKey(1), (16, S, D), dtype=jnp.float32)
    out_tiled = jax.block_until_ready(
        positional_encoding_add(x2, force_pallas=True, max_tile_bytes=4096))
    assert jnp.allclose(out_tiled, _reference(x2), atol=1e-5, rtol=1e-5)

    print("KERNEL_OK")
</pallas_src>

<mosaic_0001>
module attributes {stable_mosaic.version = 11 : i64} {
  func.func @_pe_add_kernel(%arg0: i32, %arg1: i32, %arg2: memref<2x256xf32, #tpu.memory_space<vmem>>, %arg3: memref<1x256xf32, #tpu.memory_space<vmem>>, %arg4: memref<2x256xf32, #tpu.memory_space<vmem>>) attributes {dimension_semantics = [#tpu.dimension_semantics<parallel>, #tpu.dimension_semantics<parallel>], iteration_bounds = array<i64: 1, 1>, scalar_prefetch = 0 : i64, scratch_operands = 0 : i64, tpu.core_type = #tpu.core_type<tc>, window_params = [{transform_indices = @transform_0, window_bounds = array<i64: 2, 256>}, {transform_indices = @transform_1, window_bounds = array<i64: 1, 256>}, {transform_indices = @transform_2, window_bounds = array<i64: 2, 256>}]} {
    %c0 = arith.constant 0 : index
    %c0_0 = arith.constant 0 : index
    %0 = vector.load %arg2[%c0, %c0_0] : memref<2x256xf32, #tpu.memory_space<vmem>>, vector<2x256xf32>
    %c0_1 = arith.constant 0 : index
    %c0_2 = arith.constant 0 : index
    %1 = vector.load %arg3[%c0_1, %c0_2] : memref<1x256xf32, #tpu.memory_space<vmem>>, vector<1x256xf32>
    %2 = vector.broadcast %1 : vector<1x256xf32> to vector<2x256xf32>
    %3 = arith.addf %0, %2 : vector<2x256xf32>
    %c0_3 = arith.constant 0 : index
    %c0_4 = arith.constant 0 : index
    %4 = vector.load %arg4[%c0_3, %c0_4] : memref<2x256xf32, #tpu.memory_space<vmem>>, vector<2x256xf32>
    tpu.vector_store %arg4[%c0_3, %c0_4], %3 {strides = array<i32>} : memref<2x256xf32, #tpu.memory_space<vmem>>, vector<2x256xf32>,
    return
  }
  func.func @transform_0(%arg0: i32, %arg1: i32) -> (i32, i32) {
    %c0_i32 = arith.constant 0 : i32
    return %arg0, %arg1 : i32, i32
  }
  func.func @transform_1(%arg0: i32, %arg1: i32) -> (i32, i32) {
    %c0_i32 = arith.constant 0 : i32
    %c0_i32_0 = arith.constant 0 : i32
    return %c0_i32, %arg1 : i32, i32
  }
  func.func @transform_2(%arg0: i32, %arg1: i32) -> (i32, i32) {
    %c0_i32 = arith.constant 0 : i32
    return %arg0, %arg1 : i32, i32
  }
}

</mosaic_0001>

<bundles_post_ra>
// kernel: tpu_custom_call.1
= control target key start
LH: loop header
LB: loop body
LE: loop exit
PB: predicated region body
PF: predicated region fallthrough
CT: control target
= control target key end

     0   :  { %7 = vsyncpa [#allocation3], 0  ;;  %s172_s0 = inlined_call_operand.hbm [shape: f32[2,256], index: 0, kind: input, shape index: {}]   ;;  %s173_s1 = inlined_call_operand.hbm [shape: f32[1,256], index: 1, kind: input, shape index: {}]   ;;  %s174_s2 = inlined_call_operand.hbm [shape: f32[2,256], index: 2, kind: output, shape index: {}]  }
   0x1   :  { %8 = vsyncpa [#allocation6], 0 }
   0x2   :  { %9 = vsyncpa [#allocation4], 0  ;;  %s144_s9 = smov [#allocation2]   ;;  %s145_s11 = smov [#allocation5]  }
   0x3   :  { %s16_s10 = sshll.u32 %s144_s9, 4  ;;  %s26_s12 = sshll.u32 %s145_s11, 4  ;;  %s17_s10 = int_to_ptr.vmem [resolvable:$true] %s16_s10  ;;  %s27_s12 = int_to_ptr.vmem [resolvable:$true] %s26_s12 }
   0x4   :  { %s86_s13 = scalar_lea.vmem %s17_s10, 64  ;;  %p91_p1 = scmp.lt.s32.totalorder %s17_s10, %s17_s10 }
   0x5   :  { %p87_p0 = scmp.ne.s32.totalorder %s17_s10, %s86_s13  ;;  %p92_p2 = scmp.lt.s32.totalorder %s86_s13, %s86_s13 }
   0x7   :  { %p93_p3 = por %p92_p2, %p91_p1 }
   0x9   :  { %p94_p4 = pnand %p93_p3, %p87_p0 }
   0xb   :  { %97 = shalt.err (!%p94_p4)
}
   0xc   :  { %19 = dma.hbm_to_vmem [thread:$0]  %s172_s0, 64, %s17_s10, [#allocation3]  }
   0xd   :  { %s106_s16 = scalar_lea.vmem %s27_s12, 32  ;;  %p111_p6 = scmp.lt.s32.totalorder %s27_s12, %s27_s12 }
   0xe   :  { %p107_p5 = scmp.ne.s32.totalorder %s27_s12, %s106_s16  ;;  %p112_p7 = scmp.lt.s32.totalorder %s106_s16, %s106_s16 }
  0x10   :  { %p113_p8 = por %p112_p7, %p111_p6 }
  0x12   :  { %p114_p9 = pnand %p113_p8, %p107_p5 }
  0x14   :  { %117 = shalt.err (!%p114_p9)
}
  0x15   :  { %29 = dma.hbm_to_vmem [thread:$0]  %s173_s1, 32, %s27_s12, [#allocation6]  }
  0x16   :  { %138 = dma.done.wait [#allocation3], 64  }
  0x17   :  { %139 = vsyncadd [#allocation3], 4294967232 }
  0x18   :  { %140 = dma.done.wait [#allocation6], 32  }
  0x19   :  { %141 = vsyncadd [#allocation6], 4294967264  ;;  %v39_v0 = vlaneseq  ;;  %v146_v1 = vmov 1983009808   ;;  %v37_v7 = vld [vmem:[#allocation5] sm:$0x3] }
  0x1a   :  { %v49_v2 = vunpack.c.l.s4 %v146_v1  ;;  %v36_v12 = vld [vmem:[#allocation2] sm:$0xf]  ;;  %s147_s0 = smov [#allocation7]  }
  0x1b   :  { %v40_v3 = vshrl.u32 %v39_v0, 7  ;;  %s64_s19 = sshll.u32 %s147_s0, 4  ;;  %s65_s19 = int_to_ptr.vmem [resolvable:$true] %s64_s19 }
  0x1c   :  { %v50_v6 = vunpack.c.0.s8 %v49_v2  ;;  %s118_s1 = scalar_lea.vmem %s65_s19, 64  ;;  %p123_p11 = scmp.lt.s32.totalorder %s65_s19, %s65_s19 }
  0x1d   :  { %v41_v4 = vsub.s32 0, %v40_v3  ;;  %v45_v5 = vsub.s32 1, %v40_v3  ;;  %p119_p10 = scmp.ne.s32.totalorder %s65_s19, %s118_s1  ;;  %p124_p12 = scmp.lt.s32.totalorder %s118_s1, %s118_s1 }
  0x1e   :  { %v53_v10 = vsub.s32 %v50_v6, %v40_v3 }
  0x1f   :  { %v42_v8 = vrot.slane %v37_v7, %v41_v4  ;;  %v46_v9 = vrot.slane %v37_v7, %v45_v5  ;;  %p125_p13 = por %p124_p12, %p123_p11 }
  0x21   :  { %v47_v11 = vcombine.low %v42_v8, %v46_v9  ;;  %p126_p0 = pnand %p125_p13, %p119_p10 }
  0x23   :  { %v54_v13 = vrot.slane %v47_v11, %v53_v10 }
  0x25   :  { %v56_v14 = vadd.f32 %v54_v13, %v36_v12 }
  0x27   :  { %57 = vst [vmem:[#allocation7] sm:$0xf] %v56_v14 }
  0x28   :  { %129 = shalt.err (!%p126_p0)
}
  0x29   :  { %67 = dma.vmem_to_hbm [thread:$0]  %s65_s19, 64, %s174_s2, [#allocation4]  }
  0x2a   :  { %142 = dma.done.wait [#allocation4], 64  }
  0x2b   :  { %143 = vsyncadd [#allocation4], 4294967232 }
  0x2c   :  { %71 = vsyncpa [#allocation3], 1 }
  0x2d   :  { %72 = vsyncpa [#allocation6], 1 }
  0x2e   :  { %73 = vsyncpa [#allocation4], 1 }

</bundles_post_ra>
